<compile_context>
chip_gen: v6e
topology: v6e:2x2x1
jax: 0.10.0
libtpu: 0.0.40
codegen_flags: <defaults>
</compile_context>

<pallas_src>
import types

import jax
import jax.numpy as jnp
from jax.experimental import pallas as pl
from jax.experimental.pallas import tpu as pltpu


def _round_up(x: int, m: int) -> int:
    return ((x + m - 1) // m) * m


def _vmem_budget_bytes() -> int:
    """Generation-aware VMEM budget: ~75% of physical VMEM (96 MiB on
    v5e/v6e's 128 MiB, 48 MiB on v7x's 64 MiB), 48 MiB fallback."""
    cap = 64 * 1024 * 1024
    try:
        info = pltpu.get_tpu_info()
        cap = int(getattr(info, "vmem_capacity_bytes", cap))
    except Exception:
        pass
    cap = min(max(cap, 32 * 1024 * 1024), 128 * 1024 * 1024)
    return (cap * 3) // 4


def _pick_row_chunk(rows: int, d_in: int, g: int, budget: int) -> int:
    """Largest multiple-of-8 divisor of `rows` whose double-buffered x / gx
    blocks fit next to the resident W_ih^T inside ~80% of the budget.  The cap
    grows to 1024 rows on 128-MiB-VMEM parts (v5e/v6e), stays 512 on v7x."""
    cap = 1024 if budget >= 72 * 1024 * 1024 else 512
    fixed = d_in * g * 2 + g * 4                    # resident bf16 W_ih^T + f32 bias
    avail = max((budget * 8) // 10 - fixed, 0)
    per_row = 2 * (d_in * 4 + g * 2)                # 2x (f32 x row + bf16 gx row)
    best = None
    for d in range(8, rows + 1, 8):
        if rows % d == 0 and d <= cap and d * per_row <= max(avail, per_row * 8):
            best = d
    return best if best is not None else rows       # full extent is always legal


def _pick_time_chunk(seq_len: int, bc: int, g: int, hp: int, budget: int) -> int:
    """Largest divisor of seq_len (<= 64) whose double-buffered bf16 gates_x
    chunk fits next to the resident W_hh^T, h/c scratch and output block."""
    fixed = hp * g * 2 + 4 * bc * hp * 4            # W_hh^T + h/c + 2x out block
    avail = max((budget * 8) // 10 - fixed, 0)
    per_t = 2 * bc * g * 2                          # double-buffered bf16 gx per step
    best = 1
    for d in range(1, min(seq_len, 64) + 1):
        if seq_len % d == 0 and d * per_t <= max(avail, per_t):
            best = d
    return best


def _input_projection_kernel(x_ref, wih_ref, b_ref, gx_ref):
    """Time-parallel part: gx = x @ W_ih^T + (b_ih + b_hh), stored bf16.

    x_ref   : (RC, D)    f32  — RC rows of the flattened (T*B, D) input
    wih_ref : (D, 4Hp)   bf16 — W_ih^T, single resident VMEM copy
    b_ref   : (1, 4Hp)   f32  — b_ih + b_hh (gate-padded)
    gx_ref  : (RC, 4Hp)  bf16 — gate pre-activations (input contribution)
    """
    x_bf16 = x_ref[...].astype(jnp.bfloat16)
    acc = jnp.dot(x_bf16, wih_ref[...], preferred_element_type=jnp.float32)
    gx_ref[...] = (acc + b_ref[...]).astype(gx_ref.dtype)


def _lstm_recurrence_kernel(gx_ref, whh_ref, hT_ref, h_sc, c_sc):
    """One grid step == CT LSTM timesteps for one batch chunk.

    grid = (batch_chunks, T // CT); axis 0 "parallel", axis 1 "arbitrary".
    gx_ref    : (CT, BC, 4Hp) bf16 — precomputed x@W_ih^T + bias chunk
    whh_ref   : (Hp, 4Hp)     bf16 — W_hh^T, single resident VMEM copy
    hT_ref    : (BC, Hp)      f32  — final hidden state (revisited block)
    h_sc/c_sc : (BC, Hp)      f32  — VMEM scratch carrying the recurrent state
    """
    t = pl.program_id(1)

    @pl.when(t == 0)
    def _():
        h_sc[...] = jnp.zeros_like(h_sc)
        c_sc[...] = jnp.zeros_like(c_sc)

    ct = gx_ref.shape[0]
    hp = h_sc.shape[-1]

    def step(s, carry):
        h, c = carry
        h_bf = h.astype(jnp.bfloat16)

        def gate(k):
            # Hp is a multiple of 128, so every slice is lane-aligned; per-gate
            # matmuls keep the live f32 working set at (BC, Hp), not (BC, 4Hp).
            gx_k = gx_ref[s, :, k * hp:(k + 1) * hp].astype(jnp.float32)
            return gx_k + jnp.dot(
                h_bf, whh_ref[:, k * hp:(k + 1) * hp],
                preferred_element_type=jnp.float32)

        i_g = jax.nn.sigmoid(gate(0))       # input gate
        f_g = jax.nn.sigmoid(gate(1))       # forget gate
        g_g = jnp.tanh(gate(2))             # cell candidate
        o_g = jax.nn.sigmoid(gate(3))       # output gate
        c_new = f_g * c + i_g * g_g
        h_new = o_g * jnp.tanh(c_new)
        return h_new, c_new

    # Partial unroll: step s+1's MXU push depends on step s's gate math anyway,
    # so a full unroll only inflates code size / vreg live ranges.
    unroll = max(u for u in (8, 4, 2, 1) if ct % u == 0)
    h_fin, c_fin = jax.lax.fori_loop(0, ct, step, (h_sc[...], c_sc[...]),
                                     unroll=unroll)

    h_sc[...] = h_fin
    c_sc[...] = c_fin

    @pl.when(t == pl.num_programs(1) - 1)
    def _():
        hT_ref[...] = h_fin.astype(hT_ref.dtype)


def encoder_forward(inputs, params, config):
    """Pallas implementation of Encoder.forward for a 1-layer unidirectional LSTM.

    inputs: (seq_len, batch, d_embed) float32
    returns ht[-1]: (batch, d_hidden) float32
    """
    assert config.rnn_type.lower() != "gru", "only the LSTM path is implemented"
    assert not config.birnn and config.n_layers == 1
    # TODO(synk): GRU / bidirectional / multi-layer (dropout-between-layers)
    # paths of nn.LSTM are not implemented in the kernel.

    T, B, D = inputs.shape
    assert T >= 1, "empty sequence: ht would be uninitialized"
    H = config.d_hidden
    Hp = _round_up(H, 128)          # lane-aligned per-gate width (padded lanes stay 0)
    G = 4 * Hp

    budget = _vmem_budget_bytes()

    # --- parameter repacking: gate-padded, transposed, bf16 MXU operands ---
    # torch gate order along the 4H axis is [i, f, g, o].
    w_ih4 = params["w_ih"].astype(jnp.float32).reshape(4, H, D)
    w_hh4 = params["w_hh"].astype(jnp.float32).reshape(4, H, H)
    b4 = (params["b_ih"] + params["b_hh"]).astype(jnp.float32).reshape(4, H)

    w_ih_p = jnp.zeros((4, Hp, D), jnp.float32).at[:, :H, :].set(w_ih4)
    w_hh_p = jnp.zeros((4, Hp, Hp), jnp.float32).at[:, :H, :H].set(w_hh4)
    b_p = jnp.zeros((4, Hp), jnp.float32).at[:, :H].set(b4)

    wih_t = w_ih_p.transpose(2, 0, 1).reshape(D, G).astype(jnp.bfloat16)    # (D, 4Hp)
    whh_t = w_hh_p.transpose(2, 0, 1).reshape(Hp, G).astype(jnp.bfloat16)   # (Hp, 4Hp)
    bias = b_p.reshape(1, G)                                                # f32

    # ---- Phase 1: time-parallel input projection (bf16 result -> HBM). ----
    rows = T * B
    rc = _pick_row_chunk(rows, D, G, budget)
    x2d = inputs.reshape(rows, D)
    gx2d = pl.pallas_call(
        _input_projection_kernel,
        out_shape=jax.ShapeDtypeStruct((rows, G), jnp.bfloat16),
        grid_spec=pltpu.PrefetchScalarGridSpec(
            num_scalar_prefetch=0,
            grid=(rows // rc,),
            in_specs=[
                pl.BlockSpec((rc, D), lambda r: (r, 0)),             # x row chunk
                pl.BlockSpec(memory_space=pltpu.MemorySpace.VMEM),   # W_ih^T (1 copy)
                pl.BlockSpec(memory_space=pltpu.MemorySpace.VMEM),   # bias   (1 copy)
            ],
            out_specs=pl.BlockSpec((rc, G), lambda r: (r, 0)),
        ),
        compiler_params=pltpu.CompilerParams(
            dimension_semantics=("parallel",),                       # megacore-shardable
            vmem_limit_bytes=budget,
        ),
    )(x2d, wih_t, bias)
    gx = gx2d.reshape(T, B, G)

    # ---- Phase 2: serial recurrence, batch-split ("parallel") x time-chunked. ----
    n_b = 2 if (B % 16 == 0 and B >= 16) else 1    # v7x: one batch half per TensorCore
    bc = B // n_b
    ct = _pick_time_chunk(T, bc, G, Hp, budget)

    hT_p = pl.pallas_call(
        _lstm_recurrence_kernel,
        out_shape=jax.ShapeDtypeStruct((B, Hp), jnp.float32),
        grid_spec=pltpu.PrefetchScalarGridSpec(
            num_scalar_prefetch=0,
            grid=(n_b, T // ct),
            in_specs=[
                pl.BlockSpec((ct, bc, G), lambda b, t: (t, b, 0)),   # gates_x chunk
                pl.BlockSpec(memory_space=pltpu.MemorySpace.VMEM),   # W_hh^T (1 copy)
            ],
            out_specs=pl.BlockSpec((bc, Hp), lambda b, t: (b, 0)),   # revisited block
            scratch_shapes=[
                pltpu.VMEM((bc, Hp), jnp.float32),                   # h carry
                pltpu.VMEM((bc, Hp), jnp.float32),                   # c carry
            ],
        ),
        compiler_params=pltpu.CompilerParams(
            dimension_semantics=("parallel", "arbitrary"),           # time is sequential
            vmem_limit_bytes=budget,
        ),
    )(gx, whh_t)

    return hT_p[:, :H]


def _reference_lstm_final_h(inputs, params):
    """Pure-JAX f32 reference (lax.scan) matching torch.nn.LSTM gate order i,f,g,o."""
    T, B, D = inputs.shape
    H = params["w_hh"].shape[1]
    w_ih_t = params["w_ih"].T
    w_hh_t = params["w_hh"].T
    b = params["b_ih"] + params["b_hh"]

    def step(carry, x_t):
        h, c = carry
        gates = x_t @ w_ih_t + h @ w_hh_t + b
        i = jax.nn.sigmoid(gates[:, 0 * H:1 * H])
        f = jax.nn.sigmoid(gates[:, 1 * H:2 * H])
        g = jnp.tanh(gates[:, 2 * H:3 * H])
        o = jax.nn.sigmoid(gates[:, 3 * H:4 * H])
        c = f * c + i * g
        h = o * jnp.tanh(c)
        return (h, c), None

    h0 = jnp.zeros((B, H), jnp.float32)
    (hT, _), _ = jax.lax.scan(step, (h0, h0), inputs)
    return hT


if __name__ == "__main__":
    config = types.SimpleNamespace(
        rnn_type="lstm",
        d_embed=32,
        d_hidden=32,
        n_layers=1,
        dropout_prob=0.0,
        birnn=False,
        n_cells=1,   # n_layers * (2 if birnn else 1)
    )

    T, B = 8, 2
    D, H = config.d_embed, config.d_hidden

    key = jax.random.PRNGKey(0)
    k_x, k1, k2, k3, k4 = jax.random.split(key, 5)
    scale = 1.0 / jnp.sqrt(jnp.float32(H))   # mimics torch's U(-1/sqrt(H), 1/sqrt(H))
    params = {
        "w_ih": jax.random.uniform(k1, (4 * H, D), jnp.float32, -scale, scale),
        "w_hh": jax.random.uniform(k2, (4 * H, H), jnp.float32, -scale, scale),
        "b_ih": jax.random.uniform(k3, (4 * H,), jnp.float32, -scale, scale),
        "b_hh": jax.random.uniform(k4, (4 * H,), jnp.float32, -scale, scale),
    }
    x = jax.random.normal(k_x, (T, B, D), jnp.float32)

    out = jax.block_until_ready(encoder_forward(x, params, config))
    ref = jax.block_until_ready(_reference_lstm_final_h(x, params))

    assert out.shape == (B, H)
    # bf16 MXU operands and bf16-stored gates_x (f32 accumulation / state) =>
    # looser tolerance than pure f32; validated here at short T.
    assert jnp.allclose(out, ref, atol=4e-2, rtol=4e-2), (
        "mismatch vs. lax.scan reference: max |diff| = "
        f"{float(jnp.max(jnp.abs(out - ref)))}"
    )

    print("KERNEL_OK")
</pallas_src>

<mosaic_0001>
module attributes {stable_mosaic.version = 11 : i64} {
  func.func @_input_projection_kernel(%arg0: i32, %arg1: memref<16x32xf32, #tpu.memory_space<vmem>>, %arg2: memref<32x512xbf16, #tpu.memory_space<vmem>>, %arg3: memref<1x512xf32, #tpu.memory_space<vmem>>, %arg4: memref<16x512xbf16, #tpu.memory_space<vmem>>) attributes {dimension_semantics = [#tpu.dimension_semantics<parallel>], iteration_bounds = array<i64: 1>, scalar_prefetch = 0 : i64, scratch_operands = 0 : i64, tpu.core_type = #tpu.core_type<tc>, window_params = [{transform_indices = @transform_0, window_bounds = array<i64: 16, 32>}, {pipeline_mode = #tpu.pipeline_mode<synchronous>, transform_indices = @transform_1, window_bounds = array<i64: 32, 512>}, {pipeline_mode = #tpu.pipeline_mode<synchronous>, transform_indices = @transform_2, window_bounds = array<i64: 1, 512>}, {transform_indices = @transform_3, window_bounds = array<i64: 16, 512>}]} {
    %c0 = arith.constant 0 : index
    %c0_0 = arith.constant 0 : index
    %0 = vector.load %arg1[%c0, %c0_0] : memref<16x32xf32, #tpu.memory_space<vmem>>, vector<16x32xf32>
    %1 = arith.truncf %0 : vector<16x32xf32> to vector<16x32xbf16>
    %c0_1 = arith.constant 0 : index
    %c0_2 = arith.constant 0 : index
    %2 = vector.load %arg2[%c0_1, %c0_2] : memref<32x512xbf16, #tpu.memory_space<vmem>>, vector<32x512xbf16>
    %cst = arith.constant dense<0.000000e+00> : vector<16x512xf32>
    %3 = tpu.matmul %1, %2, %cst {dimension_numbers = #tpu.dot_dimension_numbers<[1], [0], [0], [1], [0, 0, 1, 1], [], []>} : vector<16x32xbf16>, vector<32x512xbf16>, vector<16x512xf32> -> vector<16x512xf32>
    %c0_3 = arith.constant 0 : index
    %c0_4 = arith.constant 0 : index
    %4 = vector.load %arg3[%c0_3, %c0_4] : memref<1x512xf32, #tpu.memory_space<vmem>>, vector<1x512xf32>
    %5 = vector.broadcast %4 : vector<1x512xf32> to vector<16x512xf32>
    %6 = arith.addf %3, %5 : vector<16x512xf32>
    %7 = arith.truncf %6 : vector<16x512xf32> to vector<16x512xbf16>
    %c0_5 = arith.constant 0 : index
    %c0_6 = arith.constant 0 : index
    %8 = vector.load %arg4[%c0_5, %c0_6] : memref<16x512xbf16, #tpu.memory_space<vmem>>, vector<16x512xbf16>
    tpu.vector_store %arg4[%c0_5, %c0_6], %7 {strides = array<i32>} : memref<16x512xbf16, #tpu.memory_space<vmem>>, vector<16x512xbf16>,
    return
  }
  func.func @transform_0(%arg0: i32) -> (i32, i32) {
    %c0_i32 = arith.constant 0 : i32
    %c0_i32_0 = arith.constant 0 : i32
    return %arg0, %c0_i32 : i32, i32
  }
  func.func @transform_1(%arg0: i32) -> (i32, i32) {
    %c0_i32 = arith.constant 0 : i32
    %c0_i32_0 = arith.constant 0 : i32
    %c0_i32_1 = arith.constant 0 : i32
    return %c0_i32, %c0_i32_0 : i32, i32
  }
  func.func @transform_2(%arg0: i32) -> (i32, i32) {
    %c0_i32 = arith.constant 0 : i32
    %c0_i32_0 = arith.constant 0 : i32
    %c0_i32_1 = arith.constant 0 : i32
    return %c0_i32, %c0_i32_0 : i32, i32
  }
  func.func @transform_3(%arg0: i32) -> (i32, i32) {
    %c0_i32 = arith.constant 0 : i32
    %c0_i32_0 = arith.constant 0 : i32
    return %arg0, %c0_i32 : i32, i32
  }
}

</mosaic_0001>

<bundles_post_ra>
// kernel: tpu_custom_call.1
= control target key start
LH: loop header
LB: loop body
LE: loop exit
PB: predicated region body
PF: predicated region fallthrough
CT: control target
= control target key end

     0   :  { %8 = vsyncpa [#allocation3], 0  ;;  %s436_s0 = inlined_call_operand.hbm [shape: f32[16,32], index: 0, kind: input, shape index: {}]   ;;  %s437_s1 = inlined_call_operand.hbm [shape: bf16[32,512], index: 1, kind: input, shape index: {}]   ;;  %s438_s2 = inlined_call_operand.hbm [shape: f32[1,512], index: 2, kind: input, shape index: {}]   ;;  %s439_s3 = inlined_call_operand.hbm [shape: bf16[16,512], index: 3, kind: output, shape index: {}]  }
   0x1   :  { %9 = vsyncpa [#allocation6], 0 }
   0x2   :  { %10 = vsyncpa [#allocation4], 0  ;;  %s389_s12 = smov [#allocation5]  }
   0x3   :  { %s28_s13 = sshll.u32 %s389_s12, 4  ;;  %s29_s13 = int_to_ptr.vmem [resolvable:$true] %s28_s13 }
   0x4   :  { %s311_s14 = scalar_lea.vmem %s29_s13, 1024  ;;  %p316_p1 = scmp.lt.s32.totalorder %s29_s13, %s29_s13 }
   0x5   :  { %p312_p0 = scmp.ne.s32.totalorder %s29_s13, %s311_s14  ;;  %p317_p2 = scmp.lt.s32.totalorder %s311_s14, %s311_s14 }
   0x7   :  { %p318_p3 = por %p317_p2, %p316_p1 }
   0x9   :  { %p319_p4 = pnand %p318_p3, %p312_p0 }
   0xb   :  { %322 = shalt.err (!%p319_p4)
}
   0xc   :  { %s390_s15 = smov 256   ;;  %s391_s16 = smov 16  }
   0xd   :  { %34 = dma.hbm_to_vmem [thread:$0]  %s437_s1, 1024, %s29_s13, [#allocation6], %s390_s15, %s390_s15, %s391_s16  }
   0xe   :  { %s392_s19 = smov [#allocation2]  }
   0xf   :  { %s16_s20 = sshll.u32 %s392_s19, 4  ;;  %s17_s20 = int_to_ptr.vmem [resolvable:$true] %s16_s20 }
  0x10   :  { %s331_s21 = scalar_lea.vmem %s17_s20, 256  ;;  %p336_p6 = scmp.lt.s32.totalorder %s17_s20, %s17_s20 }
  0x11   :  { %p332_p5 = scmp.ne.s32.totalorder %s17_s20, %s331_s21  ;;  %p337_p7 = scmp.lt.s32.totalorder %s331_s21, %s331_s21 }
  0x13   :  { %p338_p8 = por %p337_p7, %p336_p6 }
  0x15   :  { %p339_p9 = pnand %p338_p8, %p332_p5 }
  0x17   :  { %342 = shalt.err (!%p339_p9)
}
  0x18   :  { %s393_s22 = smov 128   ;;  %s394_s23 = smov 8  }
  0x19   :  { %22 = dma.hbm_to_vmem [thread:$0]  %s436_s0, 256, %s17_s20, [#allocation3], %s393_s22, %s393_s22, %s394_s23  }
  0x1a   :  { %s395_s26 = smov [#allocation7]  }
  0x1b   :  { %s41_s27 = sshll.u32 %s395_s26, 4  ;;  %s42_s27 = int_to_ptr.vmem [resolvable:$true] %s41_s27 }
  0x1c   :  { %s351_s1 = scalar_lea.vmem %s42_s27, 64  ;;  %p356_p11 = scmp.lt.s32.totalorder %s42_s27, %s42_s27 }
  0x1d   :  { %p352_p10 = scmp.ne.s32.totalorder %s42_s27, %s351_s1  ;;  %p357_p12 = scmp.lt.s32.totalorder %s351_s1, %s351_s1 }
  0x1f   :  { %p358_p13 = por %p357_p12, %p356_p11 }
  0x21   :  { %p359_p0 = pnand %p358_p13, %p352_p10 }
  0x23   :  { %362 = shalt.err (!%p359_p0)
}
  0x24   :  { %44 = dma.hbm_to_vmem [thread:$0]  %s438_s2, 64, %s42_s27, [#allocation6]  }
  0x25   :  { %383 = dma.done.wait [#allocation3], 256  }
  0x26   :  { %384 = vsyncadd [#allocation3], 4294967040 }
  0x27   :  { %385 = dma.done.wait [#allocation6], 1088  }
  0x28   :  { %386 = vsyncadd [#allocation6], 4294966208  ;;  %v396_v0 = vmov 0   ;;  %v291_v1 = vld [vmem:[#allocation5 + $0x24] ss:$16 sps:$4 sm:$0xff]   ;;  %v56_v10 = vld [vmem:[#allocation2 + $0x8] sm:$0xff]  ;;  %v68_v12 = vlaneseq }
  0x29   :  { %164 = vmatprep.mubr.bf16.mxu0 %v396_v0  ;;  %207 = vmatprep.mubr.bf16.mxu1 %v396_v0  ;;  %v293_v2 = vld [vmem:[#allocation5 + $0x2c] ss:$16 sps:$4 sm:$0xff]   ;;  %v295_v3 = vld [vmem:[#allocation5 + $0x20] ss:$16 sps:$4 sm:$0xff]   ;;  %v296_v4 = vld [vmem:[#allocation5 + $0x28] ss:$16 sps:$4 sm:$0xff]  }
  0x2a   :  { %144 = vmatprep.subr.bf16.mxu0 %v291_v1  ;;  %187 = vmatprep.subr.bf16.mxu1 %v293_v2  ;;  %v297_v5 = vld [vmem:[#allocation5 + $0x4] ss:$16 sps:$4 sm:$0xff]   ;;  %v299_v6 = vld [vmem:[#allocation5 + $0xc] ss:$16 sps:$4 sm:$0xff]   ;;  %v301_v7 = vld [vmem:[#allocation5] ss:$16 sps:$4 sm:$0xff]  }
  0x2b   :  { %145 = vmatpush1.bf16.msra.mxu0 %v295_v3  ;;  %188 = vmatpush1.bf16.msra.mxu1 %v296_v4  ;;  %v302_v8 = vld [vmem:[#allocation5 + $0x8] ss:$16 sps:$4 sm:$0xff]   ;;  %v55_v9 = vld [vmem:[#allocation2] sm:$0xff]  ;;  %vm128_vm0 = vcmask 261120   ;;  %v69_v13 = vshrl.u32 %v68_v12, 7  ;;  %s397_s0 = smov [#allocation8]  }
  0x2c   :  { %146 = vmatprep.subr.bf16.mxu0 %v297_v5  ;;  %189 = vmatprep.subr.bf16.mxu1 %v299_v6  ;;  %v57_v11 = vpack.c.bf16 %v56_v10, %v55_v9  ;;  %v66_v18 = vld [vmem:[#allocation7] sm:$0xf]  ;;  %s251_s2 = sshll.u32 %s397_s0, 4  ;;  %s252_s2 = int_to_ptr.vmem [resolvable:$true] %s251_s2 }
  0x2d   :  { %v70_v14 = vsub.s32 0, %v69_v13  ;;  %v78_v15 = vsub.s32 2, %v69_v13  ;;  %v74_v16 = vsub.s32 1, %v69_v13  ;;  %v82_v17 = vsub.s32 3, %v69_v13  ;;  %s363_s30 = scalar_lea.vmem %s252_s2, 512  ;;  %p368_p2 = scmp.lt.s32.totalorder %s252_s2, %s252_s2 }
  0x2e   :  { %p364_p1 = scmp.ne.s32.totalorder %s252_s2, %s363_s30  ;;  %p369_p3 = scmp.lt.s32.totalorder %s363_s30, %s363_s30 }
  0x2f   :  { %147 = vmatpush1.bf16.msra.mxu0 %v301_v7  ;;  %190 = vmatpush1.bf16.msra.mxu1 %v302_v8  ;;  %v71_v19 = vrot.slane %v66_v18, %v70_v14  ;;  %v79_v20 = vrot.slane %v66_v18, %v78_v15  ;;  %v75_v21 = vrot.slane %v66_v18, %v74_v16 }
  0x30   :  { %v83_v22 = vrot.slane %v66_v18, %v82_v17  ;;  %p370_p4 = por %p369_p3, %p368_p2 }
  0x32   :  { %272 = vmatmul.mubr.msk.bf16.vlgmr.msra.gmra.mxu0 %vm128_vm0, %v57_v11  ;;  %273 = vmatmul.mubr.msk.bf16.vlgmr.msra.gmra.mxu1 %vm128_vm0, %v57_v11  ;;  %p371_p5 = pnand %p370_p4, %p364_p1 }
  0xf2   :  { %v166_v23 = vpop.f32.mrf.mxu0  ;;  %v209_v24 = vpop.f32.mrf.mxu1 }
  0xf3   :  { %v167_v27 = vadd.f32 %v166_v23, %v71_v19  ;;  %v210_v28 = vadd.f32 %v209_v24, %v79_v20 }
  0xf4   :  { %v168_v25 = vpop.f32.mrf.mxu0  ;;  %v211_v26 = vpop.f32.mrf.mxu1 }
  0xf5   :  { %v169_v29 = vadd.f32 %v168_v25, %v75_v21  ;;  %v212_v30 = vadd.f32 %v211_v26, %v83_v22 }
  0xf6   :  { %v170_v31 = vpop.f32.mrf.mxu0  ;;  %v213_v32 = vpop.f32.mrf.mxu1 }
  0xf7   :  { %v278_v33 = vpack.c.bf16 %v169_v29, %v167_v27  ;;  %v279_v34 = vpack.c.bf16 %v212_v30, %v210_v28  ;;  %v171_v37 = vadd.f32 %v170_v31, %v71_v19  ;;  %v214_v38 = vadd.f32 %v213_v32, %v79_v20 }
  0xf8   :  { %v172_v35 = vpop.f32.mrf.mxu0  ;;  %v215_v36 = vpop.f32.mrf.mxu1 }
  0xf9   :  { %242 = vst [vmem:[#allocation8] sm:$0xff] %v278_v33  ;;  %243 = vst [vmem:[#allocation8 + $0x8] sm:$0xff] %v279_v34  ;;  %v173_v39 = vadd.f32 %v172_v35, %v75_v21  ;;  %v216_v40 = vadd.f32 %v215_v36, %v83_v22 }
  0xfb   :  { %v280_v41 = vpack.c.bf16 %v173_v39, %v171_v37  ;;  %v281_v42 = vpack.c.bf16 %v216_v40, %v214_v38 }
  0xfd   :  { %244 = vst [vmem:[#allocation8 + $0x10] sm:$0xff] %v280_v41  ;;  %245 = vst [vmem:[#allocation8 + $0x18] sm:$0xff] %v281_v42 }
  0xfe   :  { %374 = shalt.err (!%p371_p5)
}
  0xff   :  { %257 = dma.vmem_to_hbm [thread:$0]  %s252_s2, 512, %s439_s3, [#allocation4], %s390_s15, %s390_s15, %s391_s16  }
 0x100   :  { %387 = dma.done.wait [#allocation4], 512  }
 0x101   :  { %388 = vsyncadd [#allocation4], 4294966784 }
 0x102   :  { %261 = vsyncpa [#allocation3], 1 }
 0x103   :  { %262 = vsyncpa [#allocation6], 1 }
 0x104   :  { %263 = vsyncpa [#allocation4], 1 }

</bundles_post_ra>
